<compile_context>
chip_gen: v7x
topology: tpu7x:2x2x1
jax: 0.10.0
libtpu: 0.0.40
codegen_flags: <defaults>
</compile_context>

<pallas_src>
import functools

import jax
import jax.numpy as jnp
from jax import lax
from jax.experimental import pallas as pl
from jax.experimental.pallas import tpu as pltpu

H = 15
H2 = 15
SIZELAT = 5

_LAYER_DIMS = [(SIZELAT, H), (H, H), (H, H2), (H2, 1)]  # (fan_in, fan_out)
_NUM_LAYERS = 4
_WPAD = 16        # padded (out, in) tile per layer
_CHUNK = 256      # lanes per inner-loop sub-chunk (bounds vreg live ranges)

# contract the last dim of both operands: out[o, n] = sum_k lhs[o, k] * rhs[n, k]
_NT_DIMS = (((1,), (1,)), ((), ()))


def _round_up(v, m):
    return ((v + m - 1) // m) * m


def _net2_hgr_kernel(x_ref, w_ref, b_ref, o_ref, *, n_chunks):
    # x_ref: (BLOCK_N, 5)   batch-major raw input tile (no host transpose)
    # w_ref: (4, 16, 16)    padded weights; layer 3 (fc4) stored transposed
    # b_ref: (4, 16, 1)     padded biases
    # o_ref: (1, BLOCK_N)   lane-dense output tile
    w1 = w_ref[0][:, :SIZELAT]      # (16, 5)   rows >= 15 are zero
    w2 = w_ref[1]                   # (16, 16)  cols/rows >= 15 are zero
    w3 = w_ref[2]                   # (16, 16)
    w4 = w_ref[3][:, 0:1]           # (16, 1)   fc4 packed as (in, out)
    b1 = b_ref[0]                   # (16, 1)
    b2 = b_ref[1]                   # (16, 1)
    b3 = b_ref[2]                   # (16, 1)
    b4 = b_ref[3][0:1, :]           # (1, 1)

    @pl.loop(0, n_chunks)
    def _(c):
        off = pl.multiple_of(c * _CHUNK, _CHUNK)
        x_bm = x_ref[pl.ds(off, _CHUNK), :]                        # (CHUNK, 5)

        # fc1 on the MXU; the batch-major -> feature-major relayout is folded
        # into the transposed contraction (out[o, n] = sum_k W1[o,k] x[n,k]).
        z1 = lax.dot_general(w1, x_bm, _NT_DIMS,
                             preferred_element_type=jnp.float32)   # (16, CHUNK)
        h1 = jnp.tanh(z1 + b1)                                     # EUP

        # fc2 / fc3: 16x16 MXU matmuls on feature-major (lane-dense) activations.
        h2 = jnp.maximum(
            jnp.dot(w2, h1, preferred_element_type=jnp.float32) + b2, 0.0)
        h3 = jnp.tanh(
            jnp.dot(w3, h2, preferred_element_type=jnp.float32) + b3)

        # fc4 (15 -> 1): full-width VPU multiply + XLU cross-sublane reduce.
        h4 = jnp.sum(w4 * h3, axis=0, keepdims=True) + b4          # (1, CHUNK)

        o_ref[:, pl.ds(off, _CHUNK)] = h4


def net2_hgr_forward(x, packed_w, packed_b, *, block_n=4096):
    """Pallas forward of Net2_HGR: x (N, SIZELAT) f32 -> (N, 1) f32."""
    n = x.shape[0]
    # Batch tile: multiple of the inner chunk, no bigger than the (rounded) data.
    block_n = _round_up(max(_CHUNK, min(block_n, _round_up(n, _CHUNK))), _CHUNK)
    # v7x has 2 TensorCores sharing the "parallel" batch axis: keep >= 2 grid
    # blocks whenever there is enough work so one core is not left idle.
    if n >= 2 * _CHUNK and pl.cdiv(n, block_n) < 2:
        block_n = _round_up(pl.cdiv(n, 2), _CHUNK)
    n_blocks = pl.cdiv(n, block_n)
    n_chunks = block_n // _CHUNK

    kernel = functools.partial(_net2_hgr_kernel, n_chunks=n_chunks)
    flops = 2 * n * (SIZELAT * H + H * H + H * H2 + H2)
    bytes_accessed = n * (SIZELAT + 1) * 4 + (packed_w.size + packed_b.size) * 4

    out = pl.pallas_call(
        kernel,
        out_shape=jax.ShapeDtypeStruct((1, n), jnp.float32),
        grid_spec=pltpu.PrefetchScalarGridSpec(
            num_scalar_prefetch=0,
            grid=(n_blocks,),
            in_specs=[
                # raw batch-major input tile; remainder handled by Pallas masking
                pl.BlockSpec((block_n, SIZELAT), lambda i: (i, 0)),
                # constant block index -> weights/biases stay VMEM-resident
                pl.BlockSpec((_NUM_LAYERS, _WPAD, _WPAD), lambda i: (0, 0, 0)),
                pl.BlockSpec((_NUM_LAYERS, _WPAD, 1), lambda i: (0, 0, 0)),
            ],
            out_specs=pl.BlockSpec((1, block_n), lambda i: (0, i)),
        ),
        compiler_params=pltpu.CompilerParams(
            dimension_semantics=("parallel",)),
        cost_estimate=pl.CostEstimate(
            flops=int(flops),
            transcendentals=int(2 * H * n),
            bytes_accessed=int(bytes_accessed)),
    )(x, packed_w, packed_b)
    # (1, N) -> (N, 1) is a pure reshape (same row-major layout): free.
    return out.reshape(n, 1)


def init_net2_hgr_params(key):
    """Mimics torch.nn.Linear default init: U(-1/sqrt(fan_in), 1/sqrt(fan_in))."""
    params = []
    for fan_in, fan_out in _LAYER_DIMS:
        key, kw, kb = jax.random.split(key, 3)
        bound = 1.0 / float(fan_in) ** 0.5
        w = jax.random.uniform(kw, (fan_out, fan_in), jnp.float32, -bound, bound)
        b = jax.random.uniform(kb, (fan_out,), jnp.float32, -bound, bound)
        params.append((w, b))
    return params


def pack_params(params):
    """Pack weights into a (4,16,16) slab and biases into a (4,16,1) slab.

    fc1..fc3 are stored (out, in); fc4 is stored transposed (in, out) so its
    single weight column is directly usable as a (16,1) lane-broadcast factor.
    All padding entries are exactly zero.
    """
    w = jnp.zeros((_NUM_LAYERS, _WPAD, _WPAD), jnp.float32)
    b = jnp.zeros((_NUM_LAYERS, _WPAD, 1), jnp.float32)
    for l in range(3):
        wl, bl = params[l]
        o, i = wl.shape
        w = w.at[l, :o, :i].set(wl)
        b = b.at[l, :o, 0].set(bl)
    w4, b4 = params[3]                       # (1, H2), (1,)
    w = w.at[3, :H2, 0].set(w4[0])           # transposed
    b = b.at[3, 0, 0].set(b4[0])
    return w, b


def net2_hgr_reference(x, params):
    """Pure-JAX reference matching the PyTorch forward."""
    (w1, b1), (w2, b2), (w3, b3), (w4, b4) = params
    h1 = jnp.tanh(x @ w1.T + b1)
    h2 = jnp.maximum(h1 @ w2.T + b2, 0.0)
    h3 = jnp.tanh(h2 @ w3.T + b3)
    return h3 @ w4.T + b4


if __name__ == "__main__":
    key = jax.random.PRNGKey(0)
    kx, kp, kx2 = jax.random.split(key, 3)

    params = init_net2_hgr_params(kp)
    w_slab, b_slab = pack_params(params)

    # Small smoke test (single partial block, single chunk).
    n_small = 8
    x_small = jax.random.normal(kx, (n_small, SIZELAT), jnp.float32)
    out_small = jax.block_until_ready(net2_hgr_forward(x_small, w_slab, b_slab))
    ref_small = net2_hgr_reference(x_small, params)
    assert out_small.shape == (n_small, 1), out_small.shape
    assert jnp.allclose(out_small, ref_small, atol=5e-5, rtol=5e-5), (
        out_small, ref_small)

    # Exercises >= 2 grid blocks, the multi-chunk inner loop, and a partial
    # remainder block (600 = 512 + 88).
    n_big = 600
    x_big = jax.random.normal(kx2, (n_big, SIZELAT), jnp.float32)
    out_big = jax.block_until_ready(net2_hgr_forward(x_big, w_slab, b_slab))
    ref_big = net2_hgr_reference(x_big, params)
    assert out_big.shape == (n_big, 1), out_big.shape
    assert jnp.allclose(out_big, ref_big, atol=5e-5, rtol=5e-5)

    print("KERNEL_OK")
</pallas_src>

<mosaic_0001>
module attributes {stable_mosaic.version = 11 : i64} {
  func.func @_net2_hgr_kernel(%arg0: i32, %arg1: memref<256x5xf32, #tpu.memory_space<vmem>>, %arg2: memref<4x16x16xf32, #tpu.memory_space<vmem>>, %arg3: memref<4x16x1xf32, #tpu.memory_space<vmem>>, %arg4: memref<1x256xf32, #tpu.memory_space<vmem>>) attributes {dimension_semantics = [#tpu.dimension_semantics<parallel>], iteration_bounds = array<i64: 1>, scalar_prefetch = 0 : i64, scratch_operands = 0 : i64, tpu.core_type = #tpu.core_type<tc>, window_params = [{transform_indices = @transform_0, window_bounds = array<i64: 256, 5>}, {pipeline_mode = #tpu.pipeline_mode<synchronous>, transform_indices = @transform_1, window_bounds = array<i64: 4, 16, 16>}, {pipeline_mode = #tpu.pipeline_mode<synchronous>, transform_indices = @transform_2, window_bounds = array<i64: 4, 16, 1>}, {transform_indices = @transform_3, window_bounds = array<i64: 1, 256>}]} {
    %c0 = arith.constant 0 : index
    %c0_0 = arith.constant 0 : index
    %c0_1 = arith.constant 0 : index
    %0 = vector.load %arg2[%c0, %c0_0, %c0_1] : memref<4x16x16xf32, #tpu.memory_space<vmem>>, vector<1x16x16xf32>
    %1 = vector.shape_cast %0 : vector<1x16x16xf32> to vector<16x16xf32>
    %2 = vector.extract_strided_slice %1 {offsets = [0, 0], sizes = [16, 5], strides = [1, 1]} : vector<16x16xf32> to vector<16x5xf32>
    %c1 = arith.constant 1 : index
    %c0_2 = arith.constant 0 : index
    %c0_3 = arith.constant 0 : index
    %3 = vector.load %arg2[%c1, %c0_2, %c0_3] : memref<4x16x16xf32, #tpu.memory_space<vmem>>, vector<1x16x16xf32>
    %4 = vector.shape_cast %3 : vector<1x16x16xf32> to vector<16x16xf32>
    %c2 = arith.constant 2 : index
    %c0_4 = arith.constant 0 : index
    %c0_5 = arith.constant 0 : index
    %5 = vector.load %arg2[%c2, %c0_4, %c0_5] : memref<4x16x16xf32, #tpu.memory_space<vmem>>, vector<1x16x16xf32>
    %6 = vector.shape_cast %5 : vector<1x16x16xf32> to vector<16x16xf32>
    %c3 = arith.constant 3 : index
    %c0_6 = arith.constant 0 : index
    %c0_7 = arith.constant 0 : index
    %7 = vector.load %arg2[%c3, %c0_6, %c0_7] : memref<4x16x16xf32, #tpu.memory_space<vmem>>, vector<1x16x16xf32>
    %8 = vector.shape_cast %7 : vector<1x16x16xf32> to vector<16x16xf32>
    %9 = vector.extract_strided_slice %8 {offsets = [0, 0], sizes = [16, 1], strides = [1, 1]} : vector<16x16xf32> to vector<16x1xf32>
    %c0_8 = arith.constant 0 : index
    %c0_9 = arith.constant 0 : index
    %c0_10 = arith.constant 0 : index
    %10 = vector.load %arg3[%c0_8, %c0_9, %c0_10] : memref<4x16x1xf32, #tpu.memory_space<vmem>>, vector<1x16x1xf32>
    %11 = vector.shape_cast %10 : vector<1x16x1xf32> to vector<16x1xf32>
    %c1_11 = arith.constant 1 : index
    %c0_12 = arith.constant 0 : index
    %c0_13 = arith.constant 0 : index
    %12 = vector.load %arg3[%c1_11, %c0_12, %c0_13] : memref<4x16x1xf32, #tpu.memory_space<vmem>>, vector<1x16x1xf32>
    %13 = vector.shape_cast %12 : vector<1x16x1xf32> to vector<16x1xf32>
    %c2_14 = arith.constant 2 : index
    %c0_15 = arith.constant 0 : index
    %c0_16 = arith.constant 0 : index
    %14 = vector.load %arg3[%c2_14, %c0_15, %c0_16] : memref<4x16x1xf32, #tpu.memory_space<vmem>>, vector<1x16x1xf32>
    %15 = vector.shape_cast %14 : vector<1x16x1xf32> to vector<16x1xf32>
    %c3_17 = arith.constant 3 : index
    %c0_18 = arith.constant 0 : index
    %c0_19 = arith.constant 0 : index
    %16 = vector.load %arg3[%c3_17, %c0_18, %c0_19] : memref<4x16x1xf32, #tpu.memory_space<vmem>>, vector<1x16x1xf32>
    %17 = vector.shape_cast %16 : vector<1x16x1xf32> to vector<16x1xf32>
    %18 = vector.extract_strided_slice %17 {offsets = [0, 0], sizes = [1, 1], strides = [1, 1]} : vector<16x1xf32> to vector<1x1xf32>
    %c0_i32 = arith.constant 0 : i32
    %c1_i32 = arith.constant 1 : i32
    %19 = arith.muli %c0_i32, %c1_i32 : i32
    %c0_i32_20 = arith.constant 0 : i32
    %20 = arith.addi %c0_i32_20, %19 : i32
    %c256_i32 = arith.constant 256 : i32
    %21 = arith.muli %20, %c256_i32 : i32
    %22 = tpu.assume_multiple %21, 256 : i32
    %23 = arith.index_cast %22 : i32 to index
    %c0_21 = arith.constant 0 : index
    %24 = vector.load %arg1[%23, %c0_21] : memref<256x5xf32, #tpu.memory_space<vmem>>, vector<256x5xf32>
    %cst = arith.constant dense<0.000000e+00> : vector<16x256xf32>
    %25 = tpu.matmul %2, %24, %cst {dimension_numbers = #tpu.dot_dimension_numbers<[1], [1], [0], [0], [0, 0, 1, 0], [], []>} : vector<16x5xf32>, vector<256x5xf32>, vector<16x256xf32> -> vector<16x256xf32>
    %26 = vector.broadcast %11 : vector<16x1xf32> to vector<16x256xf32>
    %27 = arith.addf %25, %26 : vector<16x256xf32>
    %28 = math.tanh %27 : vector<16x256xf32>
    %cst_22 = arith.constant dense<0.000000e+00> : vector<16x256xf32>
    %29 = tpu.matmul %4, %28, %cst_22 {dimension_numbers = #tpu.dot_dimension_numbers<[1], [0], [0], [1], [0, 0, 1, 1], [], []>} : vector<16x16xf32>, vector<16x256xf32>, vector<16x256xf32> -> vector<16x256xf32>
    %30 = vector.broadcast %13 : vector<16x1xf32> to vector<16x256xf32>
    %31 = arith.addf %29, %30 : vector<16x256xf32>
    %cst_23 = arith.constant 0.000000e+00 : f32
    %32 = vector.broadcast %cst_23 : f32 to vector<16x256xf32>
    %33 = arith.maximumf %31, %32 : vector<16x256xf32>
    %cst_24 = arith.constant dense<0.000000e+00> : vector<16x256xf32>
    %34 = tpu.matmul %6, %33, %cst_24 {dimension_numbers = #tpu.dot_dimension_numbers<[1], [0], [0], [1], [0, 0, 1, 1], [], []>} : vector<16x16xf32>, vector<16x256xf32>, vector<16x256xf32> -> vector<16x256xf32>
    %35 = vector.broadcast %15 : vector<16x1xf32> to vector<16x256xf32>
    %36 = arith.addf %34, %35 : vector<16x256xf32>
    %37 = math.tanh %36 : vector<16x256xf32>
    %38 = vector.broadcast %9 : vector<16x1xf32> to vector<16x256xf32>
    %39 = arith.mulf %38, %37 : vector<16x256xf32>
    %cst_25 = arith.constant dense<0.000000e+00> : vector<256xf32>
    %40 = vector.multi_reduction <add>, %39, %cst_25 [0] : vector<16x256xf32> to vector<256xf32>
    %41 = vector.shape_cast %40 : vector<256xf32> to vector<1x256xf32>
    %42 = vector.broadcast %18 : vector<1x1xf32> to vector<1x256xf32>
    %43 = arith.addf %41, %42 : vector<1x256xf32>
    %c0_26 = arith.constant 0 : index
    %44 = arith.index_cast %22 : i32 to index
    %45 = vector.load %arg4[%c0_26, %44] : memref<1x256xf32, #tpu.memory_space<vmem>>, vector<1x256xf32>
    tpu.vector_store %arg4[%c0_26, %44], %43 {strides = array<i32>} : memref<1x256xf32, #tpu.memory_space<vmem>>, vector<1x256xf32>,
    %c1_i32_27 = arith.constant 1 : i32
    return
  }
  func.func @transform_0(%arg0: i32) -> (i32, i32) {
    %c0_i32 = arith.constant 0 : i32
    %c0_i32_0 = arith.constant 0 : i32
    return %arg0, %c0_i32 : i32, i32
  }
  func.func @transform_1(%arg0: i32) -> (i32, i32, i32) {
    %c0_i32 = arith.constant 0 : i32
    %c0_i32_0 = arith.constant 0 : i32
    %c0_i32_1 = arith.constant 0 : i32
    %c0_i32_2 = arith.constant 0 : i32
    return %c0_i32, %c0_i32_0, %c0_i32_1 : i32, i32, i32
  }
  func.func @transform_2(%arg0: i32) -> (i32, i32, i32) {
    %c0_i32 = arith.constant 0 : i32
    %c0_i32_0 = arith.constant 0 : i32
    %c0_i32_1 = arith.constant 0 : i32
    %c0_i32_2 = arith.constant 0 : i32
    return %c0_i32, %c0_i32_0, %c0_i32_1 : i32, i32, i32
  }
  func.func @transform_3(%arg0: i32) -> (i32, i32) {
    %c0_i32 = arith.constant 0 : i32
    %c0_i32_0 = arith.constant 0 : i32
    return %c0_i32, %arg0 : i32, i32
  }
}

</mosaic_0001>

<bundles_post_ra>
// kernel: tpu_custom_call.1
= control target key start
LH: loop header
LB: loop body
LE: loop exit
PB: predicated region body
PF: predicated region fallthrough
CT: control target
= control target key end

     0   :  { %8 = vsyncpa [#allocation3], 0  ;;  %s900_s0 = inlined_call_operand.hbm [shape: f32[8,5], index: 0, kind: input, shape index: {}]   ;;  %s901_s1 = inlined_call_operand.vmem [shape: f32[4,16,16], index: 1, kind: input, shape index: {}]   ;;  %s902_s2 = inlined_call_operand.vmem [shape: f32[4,16,1], index: 2, kind: input, shape index: {}]   ;;  %s903_s3 = inlined_call_operand.hbm [shape: f32[1,8], index: 3, kind: output, shape index: {}]  }
   0x1   :  { %9 = vsyncpa [#allocation4], 0 }
   0x2   :  { %14 = vsyncadd [#allocation3], 3968  ;;  %s758_s12 = smov [#allocation2]   ;;  %s710_s16 = scalar_lea.hbm %s900_s0, 128 }
   0x3   :  { %s15_s13 = sshll.u32 %s758_s12, 4  ;;  %p711_p0 = scmp.ne.s32.totalorder %s900_s0, %s710_s16  ;;  %s16_s13 = int_to_ptr.vmem [resolvable:$true] %s15_s13 }
   0x4   :  { %p714_p1 = scmp.lt.u32.totalorder %s710_s16, %s900_s0 }
   0x6   :  { %p716_p2 = pnand %p714_p1, %p711_p0 }
   0x8   :  { %719 = shalt.err (!%p716_p2)
}
   0x9   :  { %s720_s21 = scalar_lea.vmem %s16_s13, 128  ;;  %s724_s22 = scalar_lea.vmem %s16_s13, 4096 }
   0xa   :  { %p721_p3 = scmp.ne.s32.totalorder %s16_s13, %s720_s21  ;;  %p725_p4 = scmp.lt.s32.totalorder %s16_s13, %s16_s13 }
   0xb   :  { %p726_p5 = scmp.lt.s32.totalorder %s724_s22, %s720_s21 }
   0xd   :  { %p727_p6 = por %p726_p5, %p725_p4 }
   0xf   :  { %p728_p7 = pnand %p727_p6, %p721_p3 }
  0x11   :  { %731 = shalt.err (!%p728_p7)
}
  0x12   :  { %s759_s23 = smov 128   ;;  %s760_s24 = smov 8  }
  0x13   :  { %21 = dma.hbm_to_vmem [thread:$0]  %s900_s0, 128, %s16_s13, [#allocation3], %s759_s23, %s759_s23, %s760_s24  }
  0x14   :  { %754 = dma.done.wait [#allocation3], 4096  }
  0x15   :  { %755 = vsyncadd [#allocation3], 4294963200  ;;  %v761_v0 = vmov 0   ;;  %vm92_vm0 = vcmask 39936   ;;  %v66_v2 = vld [vmem:[#allocation2 + $0x80] sm:$0xff]  ;;  %v67_v3 = vld [vmem:[#allocation2 + $0x88] sm:$0xff] }
  0x16   :  { %692 = vset.pattern.permute.xlu0 %v761_v0  ;;  %693 = vset.pattern.permute.xlu1 %v761_v0  ;;  %vm799_vm1 = vmpackc.low %vm92_vm0, %vm92_vm0  ;;  %v50_v4 = vld [vmem:[#allocation2] sm:$0xff]  ;;  %v629_v5 = vpack.c.bf16 %v67_v3, %v66_v2  ;;  %v51_v6 = vld [vmem:[#allocation2 + $0x8] sm:$0xff]  ;;  %v762_v57 = vmov 0.0   ;;  %vm286_vm2 = vcmask 130048  }
  0x17   :  { %v68_v7 = vld [vmem:[#allocation2 + $0x90] sm:$0xff]  ;;  %v69_v8 = vld [vmem:[#allocation2 + $0x98] sm:$0xff]  ;;  %v632_v9 = vpack.c.bf16 %v51_v6, %v50_v4  ;;  %v70_v13 = vld [vmem:[#allocation2 + $0xa0] sm:$0xff]  ;;  %357 = vmatprep.mubr.f32.mxu1 %v762_v57 }
  0x18   :  { %v635_v10 = vpack.c.bf16 %v69_v8, %v68_v7  ;;  %631 = vmatprep.subr.msk.bf16.mxu0 %vm799_vm1, %v629_v5  ;;  %v52_v11 = vld [vmem:[#allocation2 + $0x10] sm:$0xff]  ;;  %v53_v12 = vld [vmem:[#allocation2 + $0x18] sm:$0xff]  ;;  %v71_v14 = vld [vmem:[#allocation2 + $0xa8] sm:$0xff] }
  0x19   :  { %634 = vmatpush3.bf16.xpose.msk.msra.mxu0 %vm799_vm1, %v632_v9  ;;  %v638_v15 = vpack.c.bf16 %v53_v12, %v52_v11  ;;  %v641_v16 = vpack.c.bf16 %v71_v14, %v70_v13  ;;  %v29_v17 = vld [vmem:[%s901_s1] sm:$0xff]  ;;  %v55_v20 = vld [vmem:[#allocation2 + $0x28] sm:$0xff]  ;;  %v72_v22 = vld [vmem:[#allocation2 + $0xb0] sm:$0xff] }
  0x1a   :  { %637 = vmatprep.subr.msk.bf16.mxu0 %vm799_vm1, %v635_v10  ;;  %625 = vmatprep.mubr.msk.f32.mxu0 %vm92_vm0, %v29_v17  ;;  %v40_v18 = vld [vmem:[%s902_s2] sm:$0xff]  ;;  %v41_v21 = vld [vmem:[%s902_s2 + $0x8] sm:$0xff]  ;;  %v73_v23 = vld [vmem:[#allocation2 + $0xb8] sm:$0xff] }
  0x1b   :  { %84 = vperm.xlu0 %692, %v40_v18   ;;  %v54_v19 = vld [vmem:[#allocation2 + $0x20] sm:$0xff]  ;;  %v647_v25 = vpack.c.bf16 %v73_v23, %v72_v22  ;;  %v56_v27 = vld [vmem:[#allocation2 + $0x30] sm:$0xff]  ;;  %v57_v28 = vld [vmem:[#allocation2 + $0x38] sm:$0xff] }
  0x1c   :  { %v644_v24 = vpack.c.bf16 %v55_v20, %v54_v19  ;;  %v552_v26 = vld [vmem:[%s902_s2 + $0x20] sm:$0xff]  ;;  %v548_v29 = vld [vmem:[%s901_s1 + $0x30] sm:$0xff]  ;;  %v75_v31 = vld [vmem:[#allocation2 + $0xc8] sm:$0xff]  ;;  %v650_v32 = vpack.c.bf16 %v57_v28, %v56_v27 }
  0x1d   :  { %v74_v30 = vld [vmem:[#allocation2 + $0xc0] sm:$0xff]  ;;  %v554_v34 = vld [vmem:[%s902_s2 + $0x30] sm:$0xff]  ;;  %v59_v36 = vld [vmem:[#allocation2 + $0x48] sm:$0xff] }
  0x1e   :  { %v653_v33 = vpack.c.bf16 %v75_v31, %v74_v30  ;;  %v58_v35 = vld [vmem:[#allocation2 + $0x40] sm:$0xff]  ;;  %v76_v37 = vld [vmem:[#allocation2 + $0xd0] sm:$0xff]  ;;  %v77_v38 = vld [vmem:[#allocation2 + $0xd8] sm:$0xff] }
  0x1f   :  { %89 = vperm.xlu0 %692, %v41_v21   ;;  %v656_v39 = vpack.c.bf16 %v59_v36, %v58_v35  ;;  %v659_v40 = vpack.c.bf16 %v77_v38, %v76_v37  ;;  %v60_v41 = vld [vmem:[#allocation2 + $0x50] sm:$0xff]  ;;  %v61_v42 = vld [vmem:[#allocation2 + $0x58] sm:$0xff]  ;;  %v78_v43 = vld [vmem:[#allocation2 + $0xe0] sm:$0xff] }
  0x20   :  { %v79_v44 = vld [vmem:[#allocation2 + $0xe8] sm:$0xff]  ;;  %v662_v45 = vpack.c.bf16 %v61_v42, %v60_v41  ;;  %v62_v47 = vld [vmem:[#allocation2 + $0x60] sm:$0xff]  ;;  %v80_v49 = vld [vmem:[#allocation2 + $0xf0] sm:$0xff] }
  0x21   :  { %640 = vmatpush3.bf16.xpose.msk.msra.mxu0 %vm799_vm1, %v638_v15  ;;  %v665_v46 = vpack.c.bf16 %v79_v44, %v78_v43  ;;  %v63_v48 = vld [vmem:[#allocation2 + $0x68] sm:$0xff]  ;;  %v81_v50 = vld [vmem:[#allocation2 + $0xf8] sm:$0xff]  ;;  %v64_v53 = vld [vmem:[#allocation2 + $0x70] sm:$0xff] }
  0x22   :  { %643 = vmatprep.subr.msk.bf16.mxu0 %vm799_vm1, %v641_v16  ;;  %v668_v51 = vpack.c.bf16 %v63_v48, %v62_v47  ;;  %v671_v52 = vpack.c.bf16 %v81_v50, %v80_v49  ;;  %v65_v54 = vld [vmem:[#allocation2 + $0x78] sm:$0xff]  ;;  %v30_v56 = vld [vmem:[%s901_s1 + $0x8] sm:$0xff]  ;;  %v550_v58 = vld [vmem:[%s902_s2 + $0x10] sm:$0xff] }
  0x23   :  { %376 = vperm.xlu0 %692, %v552_v26   ;;  %v674_v55 = vpack.c.bf16 %v65_v54, %v64_v53  ;;  %278 = vperm.xlu1 %693, %v550_v58   ;;  %v551_v59 = vld [vmem:[%s902_s2 + $0x18] sm:$0xff]  ;;  %v553_v60 = vld [vmem:[%s902_s2 + $0x28] sm:$0xff]  ;;  %v544_v14 = vld [vmem:[%s901_s1 + $0x10] sm:$0xff] }
  0x24   :  { %v549_v61 = vld [vmem:[%s901_s1 + $0x38] sm:$0xff] }
  0x25   :  { %v545_v15 = vld [vmem:[%s901_s1 + $0x18] sm:$0xff] }
  0x27   :  { %473 = vperm.xlu0 %692, %v548_v29   ;;  %283 = vperm.xlu1 %693, %v551_v59  }
  0x29   :  { %646 = vmatpush3.bf16.xpose.msk.msra.mxu0 %vm799_vm1, %v644_v24 }
  0x2a   :  { %649 = vmatprep.subr.msk.bf16.mxu0 %vm799_vm1, %v647_v25 }
  0x2b   :  { %501 = vperm.xlu0 %692, %v554_v34   ;;  %381 = vperm.xlu1 %693, %v553_v60  }
  0x2f   :  { %478 = vperm.xlu1 %693, %v549_v61  }
  0x31   :  { %652 = vmatpush3.bf16.xpose.msk.msra.mxu0 %vm799_vm1, %v650_v32  ;;  %v546_v32 = vld [vmem:[%s901_s1 + $0x20] sm:$0xff] }
  0x32   :  { %655 = vmatprep.subr.msk.bf16.mxu0 %vm799_vm1, %v653_v33  ;;  %v547_v33 = vld [vmem:[%s901_s1 + $0x28] sm:$0xff] }
  0x39   :  { %658 = vmatpush3.bf16.xpose.msk.msra.mxu0 %vm799_vm1, %v656_v39 }
  0x3a   :  { %661 = vmatprep.subr.msk.bf16.mxu0 %vm799_vm1, %v659_v40 }
  0x41   :  { %664 = vmatpush3.bf16.xpose.msk.msra.mxu0 %vm799_vm1, %v662_v45 }
  0x42   :  { %667 = vmatprep.subr.msk.bf16.mxu0 %vm799_vm1, %v665_v46 }
  0x49   :  { %670 = vmatpush3.bf16.xpose.msk.msra.mxu0 %vm799_vm1, %v668_v51 }
  0x4a   :  { %673 = vmatprep.subr.msk.bf16.mxu0 %vm799_vm1, %v671_v52 }
  0x51   :  { %676 = vmatpush3.bf16.xpose.msk.msra.mxu0 %vm799_vm1, %v674_v55 }
  0x58   :  { %626 = vmatmul.mubr.msk.f32.vlgmr.msra.gmra.mrb[0].mxu0 %vm92_vm0, %v29_v17 }
  0x59   :  { %627 = vmatprep.mubr.msk.f32.mxu0 %vm92_vm0, %v30_v56 }
  0x5c   :  { %628 = vmatmul.mubr.msk.f32.gmra.mrb[2].mxu0 %vm92_vm0, %v30_v56 }
  0x9a   :  { %v85_v62 = vpop.permute.xlu0 %84 }
  0x9e   :  { %v90_v3 = vpop.permute.xlu0 %89 }
  0xa2   :  { %v279_v16 = vpop.permute.xlu1 %278  ;;  %v377_v34 = vpop.permute.xlu0 %376 }
  0xa6   :  { %v284_v20 = vpop.permute.xlu1 %283  ;;  %v474_v47 = vpop.permute.xlu0 %473 }
  0xaa   :  { %v382_v39 = vpop.permute.xlu1 %381 }
  0xae   :  { %v479_v48 = vpop.permute.xlu1 %478 }
 0x12b   :  { %v261_v63 = vpop.f32.mrb[0].mxu0 }
 0x12c   :  { %v262_v0 = vadd.f32 %v261_v63, %v85_v62  ;;  %v263_v1 = vpop.f32.mrb[1].mxu0 }
 0x12d   :  { %v264_v2 = vadd.f32 %v263_v1, %v85_v62  ;;  %v763_v62 = vmov 1966171168  }
 0x12e   :  { %694 = vtanh.f32 %v262_v0  ;;  %v510_v63 = vunpack.c.l.s4 %v763_v62  ;;  %v512_v0 = vlaneseq }
 0x12f   :  { %v267_v4 = vpop.f32.mrb[2].mxu0  ;;  %696 = vtanh.f32 %v264_v2 }
 0x130   :  { %v268_v5 = vadd.f32 %v267_v4, %v90_v3  ;;  %v269_v6 = vpop.f32.mrb[3].mxu0  ;;  %vm526_vm3 = vcmp.lt.s32.totalorder %v512_v0, 256 }
 0x131   :  { %v270_v7 = vadd.f32 %v269_v6, %v90_v3  ;;  %v513_v6 = vshrl.u32 %v512_v0, 7 }
 0x132   :  { %698 = vtanh.f32 %v268_v5  ;;  %v511_v5 = vunpack.c.0.s8 %v510_v63 }
 0x133   :  { %700 = vtanh.f32 %v270_v7 }
 0x138   :  { %v695_v8 = vpop.eup %694 }
 0x139   :  { %v697_v9 = vpop.eup %696 }
 0x13c   :  { %v699_v10 = vpop.eup %698 }
 0x13d   :  { %v701_v11 = vpop.eup %700  ;;  %v679_v12 = vpack.c.bf16 %v699_v10, %v695_v8  ;;  %v502_v8 = vpop.permute.xlu0 %501 }
 0x13e   :  { %v677_v13 = vpack.c.bf16 %v701_v11, %v697_v9 }
 0x140   :  { %678 = vmatprep.subr.bf16.mxu1 %v677_v13 }
 0x141   :  { %680 = vmatpush1.bf16.msra.mxu1 %v679_v12  ;;  %v514_v12 = vsub.s32 %v511_v5, %v513_v6 }
 0x144   :  { %589 = vmatmul.mubr.msk.f32.vlgmr.msra.gmra.mrb[0].mxu1 %vm286_vm2, %v544_v14 }
 0x145   :  { %363 = vmatprep.mubr.f32.mxu1 %v762_v57 }
 0x148   :  { %590 = vmatmul.mubr.msk.f32.gmra.mrb[2].mxu1 %vm286_vm2, %v545_v15 }
 0x149   :  { %454 = vmatprep.mubr.f32.mxu1 %v762_v57 }
 0x217   :  { %v359_v17 = vpop.f32.mrb[0].mxu1 }
 0x218   :  { %v361_v18 = vpop.f32.mrb[1].mxu1  ;;  %v360_v19 = vadd.f32 %v359_v17, %v279_v16 }
 0x219   :  { %v362_v21 = vadd.f32 %v361_v18, %v279_v16 }
 0x21a   :  { %v370_v26 = vmax.f32 %v360_v19, 0.0 }
 0x21b   :  { %v365_v22 = vpop.f32.mrb[2].mxu1  ;;  %v371_v28 = vmax.f32 %v362_v21, 0.0 }
 0x21c   :  { %v366_v23 = vadd.f32 %v365_v22, %v284_v20  ;;  %v367_v24 = vpop.f32.mrb[3].mxu1 }
 0x21d   :  { %v368_v25 = vadd.f32 %v367_v24, %v284_v20 }
 0x21e   :  { %v372_v27 = vmax.f32 %v366_v23, 0.0 }
 0x21f   :  { %v373_v29 = vmax.f32 %v368_v25, 0.0 }
 0x220   :  { %v683_v30 = vpack.c.bf16 %v372_v27, %v370_v26 }
 0x221   :  { %v681_v31 = vpack.c.bf16 %v373_v29, %v371_v28 }
 0x223   :  { %682 = vmatprep.subr.bf16.mxu1 %v681_v31 }
 0x224   :  { %684 = vmatpush1.bf16.msra.mxu1 %v683_v30 }
 0x227   :  { %591 = vmatmul.mubr.msk.f32.vlgmr.msra.gmra.mrb[4].mxu1 %vm286_vm2, %v546_v32 }
 0x228   :  { %460 = vmatprep.mubr.f32.mxu1 %v762_v57 }
 0x22b   :  { %592 = vmatmul.mubr.msk.f32.gmra.mrb[6].mxu1 %vm286_vm2, %v547_v33 }
 0x2fa   :  { %v456_v35 = vpop.f32.mrb[4].mxu1 }
 0x2fb   :  { %v457_v36 = vadd.f32 %v456_v35, %v377_v34  ;;  %v458_v37 = vpop.f32.mrb[5].mxu1 }
 0x2fc   :  { %v459_v38 = vadd.f32 %v458_v37, %v377_v34 }
 0x2fd   :  { %702 = vtanh.f32 %v457_v36 }
 0x2fe   :  { %v462_v40 = vpop.f32.mrb[6].mxu1  ;;  %704 = vtanh.f32 %v459_v38 }
 0x2ff   :  { %v463_v41 = vadd.f32 %v462_v40, %v382_v39  ;;  %v464_v42 = vpop.f32.mrb[7].mxu1 }
 0x300   :  { %v465_v43 = vadd.f32 %v464_v42, %v382_v39 }
 0x301   :  { %706 = vtanh.f32 %v463_v41 }
 0x302   :  { %708 = vtanh.f32 %v465_v43 }
 0x307   :  { %v703_v44 = vpop.eup %702 }
 0x308   :  { %v705_v45 = vpop.eup %704  ;;  %v481_v50 = vmul.f32 %v703_v44, %v474_v47 }
 0x309   :  { %v482_v52 = vmul.f32 %v705_v45, %v474_v47 }
 0x30b   :  { %v707_v46 = vpop.eup %706 }
 0x30c   :  { %v709_v49 = vpop.eup %708  ;;  %v483_v51 = vmul.f32 %v707_v46, %v479_v48 }
 0x30d   :  { %v484_v53 = vmul.f32 %v709_v49, %v479_v48 }
 0x30e   :  { %v485_v54 = vadd.f32 %v483_v51, %v481_v50 }
 0x30f   :  { %v492_v55 = vadd.f32 %v484_v53, %v482_v52 }
 0x310   :  { %v486_v56 = vrot.slane %v485_v54, 4 }
 0x311   :  { %v493_v57 = vrot.slane %v492_v55, 4 }
 0x312   :  { %v487_v58 = vadd.f32 %v486_v56, %v485_v54 }
 0x313   :  { %v494_v59 = vadd.f32 %v493_v57, %v492_v55 }
 0x314   :  { %v488_v60 = vrot.slane %v487_v58, 2 }
 0x315   :  { %v495_v61 = vrot.slane %v494_v59, 2 }
 0x316   :  { %v489_v1 = vadd.f32 %v488_v60, %v487_v58 }
 0x317   :  { %v496_v2 = vadd.f32 %v495_v61, %v494_v59 }
 0x318   :  { %v490_v3 = vrot.slane %v489_v1, 1 }
 0x319   :  { %v497_v4 = vrot.slane %v496_v2, 1 }
 0x31a   :  { %v491_v7 = vadd.f32 %v490_v3, %v489_v1 }
 0x31b   :  { %v498_v9 = vadd.f32 %v497_v4, %v496_v2 }
 0x31c   :  { %v504_v10 = vadd.f32 %v502_v8, %v491_v7 }
 0x31d   :  { %v505_v11 = vadd.f32 %v502_v8, %v498_v9 }
 0x31f   :  { %v508_v13 = vcombine.low %v504_v10, %v505_v11 }
 0x321   :  { %v515_v14 = vrot.slane %v508_v13, %v514_v12 }
 0x323   :  { %v522_v15 = vrot.slane %v515_v14, %v514_v12 }
 0x325   :  { %528 = vst.msk [vmem:[#allocation5] sm:$0x3] %vm526_vm3, %v522_v15 }
 0x326   :  { %533 = vsyncadd [#allocation4], 16  ;;  %s764_s1 = smov [#allocation5]  }
 0x327   :  { %s535_s27 = sshll.u32 %s764_s1, 4  ;;  %s536_s27 = int_to_ptr.vmem [resolvable:$true] %s535_s27 }
 0x328   :  { %s732_s28 = scalar_lea.vmem %s536_s27, 16  ;;  %s736_s29 = scalar_lea.vmem %s536_s27, 32 }
 0x329   :  { %p733_p8 = scmp.ne.s32.totalorder %s536_s27, %s732_s28  ;;  %p737_p9 = scmp.lt.s32.totalorder %s536_s27, %s536_s27 }
 0x32a   :  { %p738_p10 = scmp.lt.s32.totalorder %s736_s29, %s732_s28 }
 0x32c   :  { %p739_p11 = por %p738_p10, %p737_p9 }
 0x32e   :  { %p740_p12 = pnand %p739_p11, %p733_p8 }
 0x330   :  { %743 = shalt.err (!%p740_p12)
}
 0x331   :  { %s744_s5 = scalar_lea.hbm %s903_s3, 16 }
 0x332   :  { %p745_p13 = scmp.ne.s32.totalorder %s903_s3, %s744_s5  ;;  %p748_p0 = scmp.lt.u32.totalorder %s744_s5, %s903_s3 }
 0x334   :  { %p750_p1 = pnand %p748_p0, %p745_p13 }
 0x336   :  { %753 = shalt.err (!%p750_p1)
}
 0x337   :  { %538 = dma.vmem_to_hbm [thread:$0]  %s536_s27, 16, %s903_s3, [#allocation4]  }
 0x338   :  { %756 = dma.done.wait [#allocation4], 32  }
 0x339   :  { %757 = vsyncadd [#allocation4], 4294967264 }
 0x33a   :  { %542 = vsyncpa [#allocation3], 1 }
 0x33b   :  { %543 = vsyncpa [#allocation4], 1 }

</bundles_post_ra>
